<compile_context>
chip_gen: v6e
topology: v6e:2x2x1
jax: 0.10.0
libtpu: 0.0.40
codegen_flags: <defaults>
</compile_context>

<pallas_src>
import functools

import jax
import jax.numpy as jnp
from jax.experimental import pallas as pl
from jax.experimental.pallas import tpu as pltpu


def _round_up(x, m):
    return (x + m - 1) // m * m


def _pick_tiles(R, L, block_bytes=2 << 20):
    """Pick (row_tile, lane_tile) for a (R, L) f32 streaming kernel.

    lane tile: the whole row when modest (== full dim, always legal), else a
    lane-dense multiple of 128 with the tail handled by in-kernel masking.
    row tile: multiple of 8 sized so one block is ~block_bytes (~2 MiB).
    """
    tl = L if L <= 8192 else 8192
    rows = max(1, block_bytes // (tl * 4))
    tr = min(_round_up(R, 8), _round_up(rows, 8))
    return tr, tl


# ---------------------------------------------------------------------------
# Kernel 1: per-row sum / sum-of-squares over the lane (H*W) axis.
# grid = (row_tiles, lane_tiles); lane axis is the reduction ("arbitrary"),
# row axis is "parallel" (megacore). The (tr, 1) outputs stay resident across
# the lane axis (accumulator). Tail rows/lanes are masked with iota — no pad.
# ---------------------------------------------------------------------------
def _stats_kernel(x_ref, sum_ref, sq_ref, *, R, L, tr, tl):
    i = pl.program_id(0)
    j = pl.program_id(1)

    @pl.when(j == 0)
    def _():
        sum_ref[...] = jnp.zeros_like(sum_ref)
        sq_ref[...] = jnp.zeros_like(sq_ref)

    x = x_ref[...].astype(jnp.float32)

    need_row_mask = (R % tr) != 0
    need_col_mask = (L % tl) != 0
    if need_row_mask or need_col_mask:
        mask = jnp.ones(x.shape, dtype=jnp.bool_)
        if need_row_mask:
            row = jax.lax.broadcasted_iota(jnp.int32, x.shape, 0) + i * tr
            mask = mask & (row < R)
        if need_col_mask:
            col = jax.lax.broadcasted_iota(jnp.int32, x.shape, 1) + j * tl
            mask = mask & (col < L)
        x = jnp.where(mask, x, 0.0)

    sum_ref[...] += jnp.sum(x, axis=1, keepdims=True)
    sq_ref[...] += jnp.sum(x * x, axis=1, keepdims=True)


def _row_sums(x2d, tr, tl):
    R, L = x2d.shape
    grid = (pl.cdiv(R, tr), pl.cdiv(L, tl))
    return pl.pallas_call(
        functools.partial(_stats_kernel, R=R, L=L, tr=tr, tl=tl),
        out_shape=(
            jax.ShapeDtypeStruct((R, 1), jnp.float32),
            jax.ShapeDtypeStruct((R, 1), jnp.float32),
        ),
        grid_spec=pltpu.PrefetchScalarGridSpec(
            num_scalar_prefetch=0,
            grid=grid,
            in_specs=[pl.BlockSpec((tr, tl), lambda i, j: (i, j))],
            out_specs=(
                pl.BlockSpec((tr, 1), lambda i, j: (i, 0)),
                pl.BlockSpec((tr, 1), lambda i, j: (i, 0)),
            ),
        ),
        compiler_params=pltpu.CompilerParams(
            dimension_semantics=("parallel", "arbitrary"),
            vmem_limit_bytes=32 * 1024 * 1024,
        ),
    )(x2d)


# ---------------------------------------------------------------------------
# Kernel 2: elementwise normalize  out[r, :] = x[r, :] * scale[r] + shift[r]
# (per-row affine; scale/shift fold mean, var, eps, weight, bias). Lane-dense
# blocks, both grid axes parallel, no masking needed (OOB stores are dropped).
# ---------------------------------------------------------------------------
def _apply_kernel(x_ref, scale_ref, shift_ref, o_ref):
    o_ref[...] = (
        x_ref[...].astype(jnp.float32) * scale_ref[...] + shift_ref[...]
    ).astype(o_ref.dtype)


def _apply_affine(x2d, row_scale, row_shift, tr, tl):
    R, L = x2d.shape
    grid = (pl.cdiv(R, tr), pl.cdiv(L, tl))
    return pl.pallas_call(
        _apply_kernel,
        out_shape=jax.ShapeDtypeStruct((R, L), x2d.dtype),
        grid_spec=pltpu.PrefetchScalarGridSpec(
            num_scalar_prefetch=0,
            grid=grid,
            in_specs=[
                pl.BlockSpec((tr, tl), lambda i, j: (i, j)),
                pl.BlockSpec((tr, 1), lambda i, j: (i, 0)),
                pl.BlockSpec((tr, 1), lambda i, j: (i, 0)),
            ],
            out_specs=pl.BlockSpec((tr, tl), lambda i, j: (i, j)),
        ),
        compiler_params=pltpu.CompilerParams(
            dimension_semantics=("parallel", "parallel"),
            vmem_limit_bytes=32 * 1024 * 1024,
        ),
    )(x2d, row_scale, row_shift)


# ---------------------------------------------------------------------------
# Wrapper reproducing BayesianBatchNorm.forward
# ---------------------------------------------------------------------------
def bayesian_batch_norm(
    x_nchw,
    layer_rm, layer_rv, weight, bias,          # self.layer (frozen, eval)
    norm_rm0, norm_rv0,                        # self.norm running stats (0, 1)
    normed_div_mean,                           # self.normed_div_mean (zeros(1))
    eps=1e-5, momentum=0.1, block_bytes=2 << 20,
):
    N, C, H, W = x_nchw.shape
    R, L = N * C, H * W
    x2d = x_nchw.reshape(R, L)                 # free contiguous reshape (NCHW)

    tr, tl = _pick_tiles(R, L, block_bytes)

    # --- batch statistics (Pallas per-row reduction + tiny JAX combine) -----
    row_sum, row_sq = _row_sums(x2d, tr, tl)
    n = jnp.float32(N * H * W)
    ch_sum = row_sum.reshape(N, C).sum(axis=0)         # (C,) tiny
    ch_sq = row_sq.reshape(N, C).sum(axis=0)
    batch_mean = ch_sum / n
    batch_var_biased = jnp.maximum(ch_sq / n - batch_mean ** 2, 0.0)
    batch_var_unbiased = batch_var_biased * (n / jnp.maximum(n - 1.0, 1.0))

    # --- self.norm(input) running-stat update (training-mode BN) -----------
    norm_rm = (1.0 - momentum) * norm_rm0 + momentum * batch_mean
    norm_rv = (1.0 - momentum) * norm_rv0 + momentum * batch_var_unbiased

    # --- symmetric KL between source / target Gaussians (self.div) ---------
    # TODO(synk): torch.distributions KL done as tiny plain-JAX glue (O(C)).
    def _kl(mp, vp, mq, vq):
        vp = vp + 1e-5
        vq = vq + 1e-5
        k = mp.shape[0]
        return 0.5 * (
            jnp.sum(vp / vq) + jnp.sum((mq - mp) ** 2 / vq) - k
            + jnp.sum(jnp.log(vq)) - jnp.sum(jnp.log(vp))
        )
    div = 0.5 * _kl(layer_rm, layer_rv, norm_rm, norm_rv) \
        + 0.5 * _kl(norm_rm, norm_rv, layer_rm, layer_rv)

    # --- Bayesian mixing (prior = normed_div_mean = 0 in the module) -------
    prior = normed_div_mean
    running_mean = prior * layer_rm + (1.0 - prior) * norm_rm
    running_var = (
        prior * layer_rv + (1.0 - prior) * norm_rv
        + prior * (1.0 - prior) * (layer_rm - norm_rm) ** 2
    )

    # Fold into a per-channel affine, broadcast to per-row (row r -> channel
    # r % C, row order is n*C + c), then apply in the Pallas elementwise pass.
    scale_c = (weight / jnp.sqrt(running_var + eps)).astype(jnp.float32)
    shift_c = bias.astype(jnp.float32) - running_mean.astype(jnp.float32) * scale_c
    row_scale = jnp.tile(scale_c, N).reshape(R, 1)
    row_shift = jnp.tile(shift_c, N).reshape(R, 1)

    out2d = _apply_affine(x2d, row_scale, row_shift, tr, tl)
    out = out2d.reshape(N, C, H, W)            # free contiguous reshape back
    return out, div


# ---------------------------------------------------------------------------
# Pure-JAX reference (mirrors the PyTorch math) for a correctness check.
# ---------------------------------------------------------------------------
def _reference(x, layer_rm, layer_rv, weight, bias, norm_rm0, norm_rv0,
               prior, eps=1e-5, momentum=0.1):
    N, C, H, W = x.shape
    n = N * H * W
    bm = jnp.mean(x, axis=(0, 2, 3))
    bv = jnp.mean((x - bm[None, :, None, None]) ** 2, axis=(0, 2, 3))
    bvu = bv * n / (n - 1)
    nrm = (1 - momentum) * norm_rm0 + momentum * bm
    nrv = (1 - momentum) * norm_rv0 + momentum * bvu
    rm = prior * layer_rm + (1 - prior) * nrm
    rv = prior * layer_rv + (1 - prior) * nrv + prior * (1 - prior) * (layer_rm - nrm) ** 2
    return ((x - rm[None, :, None, None]) / jnp.sqrt(rv[None, :, None, None] + eps)
            * weight[None, :, None, None] + bias[None, :, None, None])


if __name__ == "__main__":
    key = jax.random.PRNGKey(0)
    kx, kw, kb, km, kv = jax.random.split(key, 5)

    N, C, H, W = 2, 4, 16, 16
    x = jax.random.normal(kx, (N, C, H, W), dtype=jnp.float32) * 2.0 + 0.5

    # self.layer (a trained BatchNorm2d): deterministic synthetic params.
    weight = jax.random.normal(kw, (C,), dtype=jnp.float32) * 0.1 + 1.0
    bias = jax.random.normal(kb, (C,), dtype=jnp.float32) * 0.1
    layer_rm = jax.random.normal(km, (C,), dtype=jnp.float32) * 0.5
    layer_rv = jax.random.uniform(kv, (C,), dtype=jnp.float32) + 0.5

    # self.norm: freshly constructed BatchNorm2d(affine=False) running stats.
    norm_rm0 = jnp.zeros((C,), jnp.float32)
    norm_rv0 = jnp.ones((C,), jnp.float32)
    # self.normed_div_mean = torch.zeros(1)  (this is the "prior")
    normed_div_mean = jnp.zeros((1,), jnp.float32)

    out, div = bayesian_batch_norm(
        x, layer_rm, layer_rv, weight, bias, norm_rm0, norm_rv0, normed_div_mean
    )
    out = jax.block_until_ready(out)
    jax.block_until_ready(div)

    ref = _reference(x, layer_rm, layer_rv, weight, bias,
                     norm_rm0, norm_rv0, normed_div_mean)
    assert out.shape == (N, C, H, W) and out.dtype == jnp.float32
    assert jnp.allclose(out, ref, atol=1e-4, rtol=1e-4)
    print("KERNEL_OK")
</pallas_src>

<mosaic_0001>
module attributes {stable_mosaic.version = 11 : i64} {
  func.func @_stats_kernel(%arg0: i32, %arg1: i32, %arg2: memref<8x256xf32, #tpu.memory_space<vmem>>, %arg3: memref<8x1xf32, #tpu.memory_space<vmem>>, %arg4: memref<8x1xf32, #tpu.memory_space<vmem>>) attributes {dimension_semantics = [#tpu.dimension_semantics<parallel>, #tpu.dimension_semantics<arbitrary>], iteration_bounds = array<i64: 1, 1>, scalar_prefetch = 0 : i64, scratch_operands = 0 : i64, tpu.core_type = #tpu.core_type<tc>, window_params = [{transform_indices = @transform_0, window_bounds = array<i64: 8, 256>}, {transform_indices = @transform_1, window_bounds = array<i64: 8, 1>}, {transform_indices = @transform_2, window_bounds = array<i64: 8, 1>}]} {
    %c0_i32 = arith.constant 0 : i32
    %0 = arith.cmpi eq, %arg1, %c0_i32 : i32
    %1 = arith.extui %0 : i1 to i32
    %c0_i32_0 = arith.constant 0 : i32
    %2 = arith.cmpi ne, %1, %c0_i32_0 : i32
    scf.if %2 {
      %cst_11 = arith.constant 0.000000e+00 : f32
      %15 = vector.broadcast %cst_11 : f32 to vector<8x1xf32>
      %c0_12 = arith.constant 0 : index
      %c0_13 = arith.constant 0 : index
      %16 = vector.load %arg3[%c0_12, %c0_13] : memref<8x1xf32, #tpu.memory_space<vmem>>, vector<8x1xf32>
      tpu.vector_store %arg3[%c0_12, %c0_13], %15 {strides = array<i32>} : memref<8x1xf32, #tpu.memory_space<vmem>>, vector<8x1xf32>,
      %cst_14 = arith.constant 0.000000e+00 : f32
      %17 = vector.broadcast %cst_14 : f32 to vector<8x1xf32>
      %c0_15 = arith.constant 0 : index
      %c0_16 = arith.constant 0 : index
      %18 = vector.load %arg4[%c0_15, %c0_16] : memref<8x1xf32, #tpu.memory_space<vmem>>, vector<8x1xf32>
      tpu.vector_store %arg4[%c0_15, %c0_16], %17 {strides = array<i32>} : memref<8x1xf32, #tpu.memory_space<vmem>>, vector<8x1xf32>,
    } else {
    }
    %c0 = arith.constant 0 : index
    %c0_1 = arith.constant 0 : index
    %3 = vector.load %arg2[%c0, %c0_1] : memref<8x256xf32, #tpu.memory_space<vmem>>, vector<8x256xf32>
    %c0_2 = arith.constant 0 : index
    %c0_3 = arith.constant 0 : index
    %4 = vector.load %arg3[%c0_2, %c0_3] : memref<8x1xf32, #tpu.memory_space<vmem>>, vector<8x1xf32>
    %cst = arith.constant dense<0.000000e+00> : vector<8xf32>
    %5 = vector.multi_reduction <add>, %3, %cst [1] : vector<8x256xf32> to vector<8xf32>
    %6 = vector.shape_cast %5 : vector<8xf32> to vector<8x1xf32>
    %7 = arith.addf %4, %6 : vector<8x1xf32>
    %c0_4 = arith.constant 0 : index
    %c0_5 = arith.constant 0 : index
    %8 = vector.load %arg3[%c0_4, %c0_5] : memref<8x1xf32, #tpu.memory_space<vmem>>, vector<8x1xf32>
    tpu.vector_store %arg3[%c0_4, %c0_5], %7 {strides = array<i32>} : memref<8x1xf32, #tpu.memory_space<vmem>>, vector<8x1xf32>,
    %c0_6 = arith.constant 0 : index
    %c0_7 = arith.constant 0 : index
    %9 = vector.load %arg4[%c0_6, %c0_7] : memref<8x1xf32, #tpu.memory_space<vmem>>, vector<8x1xf32>
    %10 = arith.mulf %3, %3 : vector<8x256xf32>
    %cst_8 = arith.constant dense<0.000000e+00> : vector<8xf32>
    %11 = vector.multi_reduction <add>, %10, %cst_8 [1] : vector<8x256xf32> to vector<8xf32>
    %12 = vector.shape_cast %11 : vector<8xf32> to vector<8x1xf32>
    %13 = arith.addf %9, %12 : vector<8x1xf32>
    %c0_9 = arith.constant 0 : index
    %c0_10 = arith.constant 0 : index
    %14 = vector.load %arg4[%c0_9, %c0_10] : memref<8x1xf32, #tpu.memory_space<vmem>>, vector<8x1xf32>
    tpu.vector_store %arg4[%c0_9, %c0_10], %13 {strides = array<i32>} : memref<8x1xf32, #tpu.memory_space<vmem>>, vector<8x1xf32>,
    return
  }
  func.func @transform_0(%arg0: i32, %arg1: i32) -> (i32, i32) {
    %c0_i32 = arith.constant 0 : i32
    return %arg0, %arg1 : i32, i32
  }
  func.func @transform_1(%arg0: i32, %arg1: i32) -> (i32, i32) {
    %c0_i32 = arith.constant 0 : i32
    %c0_i32_0 = arith.constant 0 : i32
    return %arg0, %c0_i32 : i32, i32
  }
  func.func @transform_2(%arg0: i32, %arg1: i32) -> (i32, i32) {
    %c0_i32 = arith.constant 0 : i32
    %c0_i32_0 = arith.constant 0 : i32
    return %arg0, %c0_i32 : i32, i32
  }
}

</mosaic_0001>

<bundles_post_ra>
// kernel: tpu_custom_call.1
= control target key start
LH: loop header
LB: loop body
LE: loop exit
PB: predicated region body
PF: predicated region fallthrough
CT: control target
= control target key end

     0   :  { %8 = vsyncpa [#allocation3], 0  ;;  %s79_s9 = smov [#allocation2]   ;;  %s121_s0 = inlined_call_operand.hbm [shape: f32[8,256], index: 0, kind: input, shape index: {}]   ;;  %s122_s1 = inlined_call_operand.vmem [shape: f32[8,1], index: 1, kind: output, shape index: {0}]   ;;  %s123_s2 = inlined_call_operand.vmem [shape: f32[8,1], index: 2, kind: output, shape index: {1}]  }
   0x1   :  { %s15_s10 = sshll.u32 %s79_s9, 4  ;;  %s16_s10 = int_to_ptr.vmem [resolvable:$true] %s15_s10 }
   0x2   :  { %s65_s11 = scalar_lea.vmem %s16_s10, 256  ;;  %p70_p1 = scmp.lt.s32.totalorder %s16_s10, %s16_s10 }
   0x3   :  { %p66_p0 = scmp.ne.s32.totalorder %s16_s10, %s65_s11  ;;  %p71_p2 = scmp.lt.s32.totalorder %s65_s11, %s65_s11 }
   0x5   :  { %p72_p3 = por %p71_p2, %p70_p1 }
   0x7   :  { %p73_p4 = pnand %p72_p3, %p66_p0 }
   0x9   :  { %76 = shalt.err (!%p73_p4)
}
   0xa   :  { %18 = dma.hbm_to_vmem [thread:$0]  %s121_s0, 256, %s16_s10, [#allocation3]  }
   0xb   :  { %77 = dma.done.wait [#allocation3], 256  }
   0xc   :  { %78 = vsyncadd [#allocation3], 4294967040  ;;  %vm26_vm0 = vcmask 7168   ;;  %v80_v0 = vmov 0.0   ;;  %v29_v1 = vld [vmem:[#allocation2] sm:$0xff]  ;;  %v30_v2 = vld [vmem:[#allocation2 + $0x8] sm:$0xff] }
   0xd   :  { %27 = vst.msk [vmem:[%s122_s1] sm:$0xff] %vm26_vm0, %v80_v0  ;;  %28 = vst.msk [vmem:[%s123_s2] sm:$0xff] %vm26_vm0, %v80_v0  ;;  %v32_v3 = vadd.f32 %v30_v2, %v29_v1  ;;  %v39_v4 = vmul.f32 %v29_v1, %v29_v1  ;;  %v40_v5 = vmul.f32 %v30_v2, %v30_v2 }
   0xf   :  { %33 = vadd.xlane.f32.xlu0 %v32_v3  ;;  %v41_v6 = vadd.f32 %v40_v5, %v39_v4 }
  0x13   :  { %42 = vadd.xlane.f32.xlu0 %v41_v6 }
  0x14   :  { %v31_v7 = vld [vmem:[%s122_s1] sm:$0xff] }
  0x15   :  { %v38_v10 = vld [vmem:[%s123_s2] sm:$0xff] }
  0x98   :  { %v34_v8 = vpop.xlane.xlu0 %33 }
  0x99   :  { %v35_v9 = vadd.f32 %v34_v8, %v31_v7 }
  0x9b   :  { %37 = vst.msk [vmem:[%s122_s1] sm:$0xff] %vm26_vm0, %v35_v9 }
  0x9c   :  { %v43_v11 = vpop.xlane.xlu0 %42 }
  0x9d   :  { %v44_v12 = vadd.f32 %v43_v11, %v38_v10 }
  0x9f   :  { %45 = vst.msk [vmem:[%s123_s2] sm:$0xff] %vm26_vm0, %v44_v12 }
  0xa0   :  { %54 = vsyncpa [#allocation3], 1 }

</bundles_post_ra>
